<compile_context>
chip_gen: v6e
topology: v6e:2x2x1
jax: 0.10.0
libtpu: 0.0.40
codegen_flags: <defaults>
</compile_context>

<pallas_src>
import functools

import jax
import jax.numpy as jnp
from jax.experimental import pallas as pl
from jax.experimental.pallas import tpu as pltpu


_F32_MIN = float(jnp.finfo(jnp.float32).min)


def _round_up(x, m):
    return (x + m - 1) // m * m


def _soft_hkr_kernel(cmean_ref, labels_ref, logits_ref,     # inputs
                     loss_ref, mean_out_ref,                 # outputs (SMEM)
                     acc_abs_ref, acc_loss_ref,              # VMEM accumulators
                     *maybe_cache,
                     alpha, min_margin, alpha_mean, temperature,
                     batch, n_classes, use_cache, ragged):
    cache_ref = maybe_cache[0] if use_cache else None

    p = pl.program_id(0)        # phase: 0 = global sum(|x|), 1 = loss
    i = pl.program_id(1)        # batch-tile index
    n_i = pl.num_programs(1)

    tb, cpad = logits_ref.shape

    @pl.when((p == 0) & (i == 0))
    def _init():
        acc_abs_ref[...] = jnp.zeros_like(acc_abs_ref)
        acc_loss_ref[...] = jnp.zeros_like(acc_loss_ref)

    @pl.when(p == 0)
    def _phase0():
        x_raw = logits_ref[...]
        if use_cache:
            cache_ref[i] = x_raw          # stash tile (HBM dtype) for phase 1
        xa = jnp.abs(x_raw.astype(jnp.float32))
        # Padded rows/cols are zero-filled by the wrapper: no masking needed.
        acc_abs_ref[...] += jnp.sum(xa, axis=0, keepdims=True)

    @pl.when(p == 1)
    def _phase1():
        if use_cache:
            x_raw = cache_ref[i]          # VMEM-resident copy (no HBM re-read)
        else:
            x_raw = logits_ref[...]
        x = x_raw.astype(jnp.float32)

        labels = labels_ref[...]                                    # (tb,1) i32
        col_ids = jax.lax.broadcasted_iota(jnp.int32, (tb, cpad), 1)
        is_true = col_ids == labels

        # ---- _update_mean / temperature (cheap scalar math per tile) --------
        sum_abs = jnp.sum(acc_abs_ref[...])
        mean_abs = sum_abs * (1.0 / (batch * n_classes))
        cgm = alpha_mean * cmean_ref[0] + (1.0 - alpha_mean) * mean_abs
        total_mean = jnp.clip(cgm, min_margin, 20000.0)
        temp = jnp.clip(temperature / total_mean, 0.005, 250.0)

        # ---- temperature softmax over non-true (and non-padded) classes -----
        vals = jnp.where(is_true, _F32_MIN, temp * x)
        if n_classes < cpad:
            col_pad = col_ids >= n_classes
            vals = jnp.where(col_pad, _F32_MIN, vals)
        row_max = jnp.max(vals, axis=-1, keepdims=True)
        exps = jnp.exp(vals - row_max)          # masked lanes underflow to 0
        if n_classes < cpad:
            exps = jnp.where(col_pad, 0.0, exps)   # harden pad columns
        denom = jnp.maximum(jnp.sum(exps, axis=-1, keepdims=True), 1e-30)
        f_soft_kr = exps / denom                # exact divide (bit parity)
        f_soft_kr = jnp.where(is_true, 1.0, f_soft_kr)

        # ---- signed predictions, fused KR + hinge ----------------------------
        signed = jnp.where(is_true, x, -x)
        hinge = jnp.maximum(min_margin * 0.5 - signed, 0.0)
        per_elem = (alpha * hinge - (1.0 - alpha) * signed) * f_soft_kr

        if ragged:
            row_ids = jax.lax.broadcasted_iota(jnp.int32, (tb, cpad), 0)
            per_elem = jnp.where(row_ids + i * tb < batch, per_elem, 0.0)

        acc_loss_ref[...] += jnp.sum(per_elem, axis=0, keepdims=True)

        @pl.when(i == n_i - 1)
        def _finalize():
            loss_ref[0, 0] = jnp.sum(acc_loss_ref[...]) * (1.0 / batch)
            # Persisted running mean: module clamps to [0.005, 1000].
            mean_out_ref[0, 0] = jnp.clip(cgm, 0.005, 1000.0)


def soft_hkr_multiclass_loss(logits, labels, *,
                             alpha=0.5, min_margin=1.0,
                             alpha_mean=0.99, temperature=1.0,
                             current_mean=None, return_updated_mean=False,
                             max_tile_rows=2048, max_tile_bytes=4 * 1024 * 1024,
                             cache_vmem_budget_bytes=36 * 1024 * 1024):
    """JAX wrapper mirroring SoftHKRMulticlassLoss.forward.

    Returns the scalar loss (and optionally the updated running mean that the
    PyTorch module persists into its `current_mean` buffer).
    """
    assert 0.0 <= alpha <= 1.0
    B, C = logits.shape
    if current_mean is None:
        # Module initializes self.current_mean = (min_margin_v,)
        current_mean = jnp.full((1,), float(min_margin), dtype=jnp.float32)
    else:
        current_mean = jnp.asarray(current_mean, dtype=jnp.float32).reshape((1,))

    itemsize = logits.dtype.itemsize
    cpad = _round_up(C, 128)
    # Target 1-4 MiB logits tiles (streaming roofline); dtype-aware row count.
    rows_by_vmem = max(8, (max_tile_bytes // (cpad * itemsize)) // 8 * 8)
    tb = int(min(max_tile_rows, rows_by_vmem, _round_up(B, 8)))
    bpad = _round_up(B, tb)
    n_tiles = bpad // tb
    ragged = bpad != B

    # Logits keep their HBM dtype (bf16 OK) -> cast to f32 inside the kernel.
    logits_p = jnp.pad(logits, ((0, bpad - B), (0, cpad - C)))
    labels_p = jnp.pad(labels.astype(jnp.int32), (0, bpad - B)).reshape(bpad, 1)

    # Single-HBM-read path: cache every logits tile in VMEM during phase 0 and
    # read the cache in phase 1 when the whole padded block fits the budget.
    cache_bytes = n_tiles * tb * cpad * itemsize
    stream_bytes = 2 * tb * cpad * itemsize          # double-buffered logits
    labels_bytes = 2 * tb * 128 * 4                  # (tb,1) i32 lane-pads 128x
    work_bytes = 6 * tb * cpad * 4                   # f32 temporaries margin
    acc_bytes = 2 * cpad * 4
    use_cache = (cache_bytes + stream_bytes + labels_bytes + work_bytes +
                 acc_bytes) <= cache_vmem_budget_bytes
    # TODO(synk): derive cache/vmem budgets per generation (v7x 64 MiB/TC vs
    # v5e/v6e 128 MiB) via pltpu.get_tpu_info instead of one conservative cap.

    kernel = functools.partial(
        _soft_hkr_kernel,
        alpha=float(alpha),
        min_margin=float(min_margin),
        alpha_mean=float(alpha_mean),
        # Module sets self.temperature = temperature * min_margin_v.
        temperature=float(temperature) * float(min_margin),
        batch=B, n_classes=C,
        use_cache=use_cache, ragged=ragged)

    if use_cache:
        # Phase 1 pins block 0 -> unchanged block, pipeliner skips the fetch.
        logits_spec = pl.BlockSpec((tb, cpad), lambda p, i: (i * (1 - p), 0))
    else:
        logits_spec = pl.BlockSpec((tb, cpad), lambda p, i: (i, 0))

    scratch = [pltpu.VMEM((1, cpad), jnp.float32),     # sum(|x|) partials
               pltpu.VMEM((1, cpad), jnp.float32)]     # loss partials
    if use_cache:
        scratch.append(pltpu.VMEM((n_tiles, tb, cpad), logits_p.dtype))

    grid_spec = pltpu.PrefetchScalarGridSpec(
        num_scalar_prefetch=0,
        grid=(2, n_tiles),                                    # (phase, tiles)
        in_specs=[
            pl.BlockSpec(memory_space=pltpu.MemorySpace.SMEM),   # current_mean
            # Labels only needed in phase 1: keep block 0 resident in phase 0.
            pl.BlockSpec((tb, 1), lambda p, i: (i * p, 0)),      # labels
            logits_spec,                                          # logits
        ],
        out_specs=[
            pl.BlockSpec(memory_space=pltpu.MemorySpace.SMEM),   # loss (1,1)
            pl.BlockSpec(memory_space=pltpu.MemorySpace.SMEM),   # new mean (1,1)
        ],
        scratch_shapes=scratch,
    )

    hbm_reads = 1 if use_cache else 2
    cost = pl.CostEstimate(
        flops=14 * bpad * cpad,
        transcendentals=bpad * cpad,
        bytes_accessed=hbm_reads * bpad * cpad * itemsize + bpad * 4 + 12,
    )

    loss, new_mean = pl.pallas_call(
        kernel,
        out_shape=(jax.ShapeDtypeStruct((1, 1), jnp.float32),
                   jax.ShapeDtypeStruct((1, 1), jnp.float32)),
        grid_spec=grid_spec,
        compiler_params=pltpu.CompilerParams(
            # Both grid axes carry accumulator dependencies -> "arbitrary".
            # TODO(synk): v7x dual-TC split (per-core partials + core barrier,
            # or a two-pallas_call structure) left as future work.
            dimension_semantics=("arbitrary", "arbitrary"),
            vmem_limit_bytes=48 * 1024 * 1024),
        cost_estimate=cost,
    )(current_mean, labels_p, logits_p)

    if return_updated_mean:
        return loss[0, 0], new_mean[0, 0]
    return loss[0, 0]


def _reference(logits, labels, *, alpha, min_margin, alpha_mean, temperature,
               current_mean):
    """Pure-JAX transcription of SoftHKRMulticlassLoss.forward (for checking)."""
    x = logits.astype(jnp.float32)
    C = x.shape[1]
    y_true = jax.nn.one_hot(labels, C, dtype=jnp.float32)
    mean_abs = jnp.mean(jnp.abs(x))
    cgm = alpha_mean * current_mean + (1.0 - alpha_mean) * mean_abs
    new_mean = jnp.clip(cgm, 0.005, 1000.0)
    total_mean = jnp.clip(cgm, min_margin, 20000.0)
    temp = jnp.clip((temperature * min_margin) / total_mean, 0.005, 250.0)
    minv = jnp.finfo(jnp.float32).min
    opp = jnp.where(y_true > 0, minv, temp * x)
    f = jax.nn.softmax(opp, axis=-1)
    f = jnp.where(y_true > 0, 1.0, f)
    signed = jnp.where(y_true > 0, x, -x)
    kr = -signed
    hinge = jnp.maximum(min_margin / 2.0 - signed, 0.0)
    loss_b = jnp.sum(((1.0 - alpha) * kr + alpha * hinge) * f, axis=-1)
    return jnp.mean(loss_b), jnp.reshape(new_mean, ())


if __name__ == "__main__":
    key = jax.random.PRNGKey(0)
    k1, k2, k3, k4 = jax.random.split(key, 4)

    # Case 1: small, single tile, cached (single-HBM-read) path.
    batch, num_classes = 8, 16
    logits = jax.random.normal(k1, (batch, num_classes), dtype=jnp.float32) * 2.0
    labels = jax.random.randint(k2, (batch,), 0, num_classes, dtype=jnp.int32)

    loss, new_mean = soft_hkr_multiclass_loss(
        logits, labels, alpha=0.5, min_margin=1.0, alpha_mean=0.99,
        temperature=1.0, return_updated_mean=True)
    jax.block_until_ready(loss)
    ref_loss, ref_mean = _reference(logits, labels, alpha=0.5, min_margin=1.0,
                                    alpha_mean=0.99, temperature=1.0,
                                    current_mean=1.0)
    assert abs(float(loss) - float(ref_loss)) <= 2e-3 * (1.0 + abs(float(ref_loss)))
    assert abs(float(new_mean) - float(ref_mean)) <= 2e-3 * (1.0 + abs(float(ref_mean)))

    # Case 2: force the streaming (two-read) fallback path on the same inputs.
    loss_s = soft_hkr_multiclass_loss(
        logits, labels, alpha=0.5, min_margin=1.0, alpha_mean=0.99,
        temperature=1.0, cache_vmem_budget_bytes=0)
    jax.block_until_ready(loss_s)
    assert abs(float(loss_s) - float(ref_loss)) <= 2e-3 * (1.0 + abs(float(ref_loss)))

    # Case 3: multi-tile, ragged batch.
    b2, c2 = 20, 10
    logits2 = jax.random.normal(k3, (b2, c2), dtype=jnp.float32) * 3.0
    labels2 = jax.random.randint(k4, (b2,), 0, c2, dtype=jnp.int32)
    loss2 = soft_hkr_multiclass_loss(
        logits2, labels2, alpha=0.9, min_margin=0.7, alpha_mean=0.99,
        temperature=2.0, max_tile_rows=8)
    jax.block_until_ready(loss2)
    ref_loss2, _ = _reference(logits2, labels2, alpha=0.9, min_margin=0.7,
                              alpha_mean=0.99, temperature=2.0,
                              current_mean=0.7)
    assert abs(float(loss2) - float(ref_loss2)) <= 2e-3 * (1.0 + abs(float(ref_loss2)))

    print("KERNEL_OK")
</pallas_src>

<mosaic_0001>
module attributes {stable_mosaic.version = 11 : i64} {
  func.func @_soft_hkr_kernel(%arg0: i32, %arg1: i32, %arg2: memref<1xf32, #tpu.memory_space<smem>>, %arg3: memref<8x1xi32, #tpu.memory_space<vmem>>, %arg4: memref<8x128xf32, #tpu.memory_space<vmem>>, %arg5: memref<1x1xf32, #tpu.memory_space<smem>>, %arg6: memref<1x1xf32, #tpu.memory_space<smem>>, %arg7: memref<1x128xf32, #tpu.memory_space<vmem>>, %arg8: memref<1x128xf32, #tpu.memory_space<vmem>>, %arg9: memref<1x8x128xf32, #tpu.memory_space<vmem>>) attributes {dimension_semantics = [#tpu.dimension_semantics<arbitrary>, #tpu.dimension_semantics<arbitrary>], iteration_bounds = array<i64: 2, 1>, scalar_prefetch = 0 : i64, scratch_operands = 3 : i64, tpu.core_type = #tpu.core_type<tc>, window_params = [{transform_indices = @transform_0, window_bounds = array<i64: 1>}, {transform_indices = @transform_1, window_bounds = array<i64: 8, 1>}, {transform_indices = @transform_2, window_bounds = array<i64: 8, 128>}, {transform_indices = @transform_3, window_bounds = array<i64: 1, 1>}, {transform_indices = @transform_4, window_bounds = array<i64: 1, 1>}]} {
    %c0_i32 = arith.constant 0 : i32
    %0 = arith.cmpi eq, %arg0, %c0_i32 : i32
    %c0_i32_0 = arith.constant 0 : i32
    %1 = arith.cmpi eq, %arg1, %c0_i32_0 : i32
    %2 = arith.andi %0, %1 : i1
    %3 = arith.extui %2 : i1 to i32
    %c0_i32_1 = arith.constant 0 : i32
    %4 = arith.cmpi ne, %3, %c0_i32_1 : i32
    scf.if %4 {
      %cst = arith.constant 0.000000e+00 : f32
      %11 = vector.broadcast %cst : f32 to vector<1x128xf32>
      %c0 = arith.constant 0 : index
      %c0_5 = arith.constant 0 : index
      %12 = vector.load %arg7[%c0, %c0_5] : memref<1x128xf32, #tpu.memory_space<vmem>>, vector<1x128xf32>
      tpu.vector_store %arg7[%c0, %c0_5], %11 {strides = array<i32>} : memref<1x128xf32, #tpu.memory_space<vmem>>, vector<1x128xf32>,
      %cst_6 = arith.constant 0.000000e+00 : f32
      %13 = vector.broadcast %cst_6 : f32 to vector<1x128xf32>
      %c0_7 = arith.constant 0 : index
      %c0_8 = arith.constant 0 : index
      %14 = vector.load %arg8[%c0_7, %c0_8] : memref<1x128xf32, #tpu.memory_space<vmem>>, vector<1x128xf32>
      tpu.vector_store %arg8[%c0_7, %c0_8], %13 {strides = array<i32>} : memref<1x128xf32, #tpu.memory_space<vmem>>, vector<1x128xf32>,
    } else {
    }
    %c0_i32_2 = arith.constant 0 : i32
    %5 = arith.cmpi eq, %arg0, %c0_i32_2 : i32
    %6 = arith.extui %5 : i1 to i32
    %c0_i32_3 = arith.constant 0 : i32
    %7 = arith.cmpi ne, %6, %c0_i32_3 : i32
    scf.if %7 {
      %c0 = arith.constant 0 : index
      %c0_5 = arith.constant 0 : index
      %11 = vector.load %arg4[%c0, %c0_5] : memref<8x128xf32, #tpu.memory_space<vmem>>, vector<8x128xf32>
      %12 = arith.index_cast %arg1 : i32 to index
      %c0_6 = arith.constant 0 : index
      %c0_7 = arith.constant 0 : index
      %13 = vector.load %arg9[%12, %c0_6, %c0_7] : memref<1x8x128xf32, #tpu.memory_space<vmem>>, vector<1x8x128xf32>
      %14 = vector.shape_cast %13 : vector<1x8x128xf32> to vector<8x128xf32>
      %15 = vector.shape_cast %11 : vector<8x128xf32> to vector<1x8x128xf32>
      tpu.vector_store %arg9[%12, %c0_6, %c0_7], %15 {strides = array<i32>} : memref<1x8x128xf32, #tpu.memory_space<vmem>>, vector<1x8x128xf32>,
      %16 = math.absf %11 : vector<8x128xf32>
      %c0_8 = arith.constant 0 : index
      %c0_9 = arith.constant 0 : index
      %17 = vector.load %arg7[%c0_8, %c0_9] : memref<1x128xf32, #tpu.memory_space<vmem>>, vector<1x128xf32>
      %cst = arith.constant dense<0.000000e+00> : vector<128xf32>
      %18 = vector.multi_reduction <add>, %16, %cst [0] : vector<8x128xf32> to vector<128xf32>
      %19 = vector.shape_cast %18 : vector<128xf32> to vector<1x128xf32>
      %20 = arith.addf %17, %19 : vector<1x128xf32>
      %c0_10 = arith.constant 0 : index
      %c0_11 = arith.constant 0 : index
      %21 = vector.load %arg7[%c0_10, %c0_11] : memref<1x128xf32, #tpu.memory_space<vmem>>, vector<1x128xf32>
      tpu.vector_store %arg7[%c0_10, %c0_11], %20 {strides = array<i32>} : memref<1x128xf32, #tpu.memory_space<vmem>>, vector<1x128xf32>,
    } else {
    }
    %c1_i32 = arith.constant 1 : i32
    %8 = arith.cmpi eq, %arg0, %c1_i32 : i32
    %9 = arith.extui %8 : i1 to i32
    %c0_i32_4 = arith.constant 0 : i32
    %10 = arith.cmpi ne, %9, %c0_i32_4 : i32
    scf.if %10 {
      %11 = arith.index_cast %arg1 : i32 to index
      %c0 = arith.constant 0 : index
      %c0_5 = arith.constant 0 : index
      %12 = vector.load %arg9[%11, %c0, %c0_5] : memref<1x8x128xf32, #tpu.memory_space<vmem>>, vector<1x8x128xf32>
      %13 = vector.shape_cast %12 : vector<1x8x128xf32> to vector<8x128xf32>
      %c0_6 = arith.constant 0 : index
      %c0_7 = arith.constant 0 : index
      %14 = vector.load %arg3[%c0_6, %c0_7] : memref<8x1xi32, #tpu.memory_space<vmem>>, vector<8x1xi32>
      %15 = tpu.iota {dimensions = array<i32: 1>} : vector<8x128xi32>
      %16 = vector.broadcast %14 : vector<8x1xi32> to vector<8x128xi32>
      %17 = arith.cmpi eq, %15, %16 : vector<8x128xi32>
      %c0_8 = arith.constant 0 : index
      %c0_9 = arith.constant 0 : index
      %18 = vector.load %arg7[%c0_8, %c0_9] : memref<1x128xf32, #tpu.memory_space<vmem>>, vector<1x128xf32>
      %19 = vector.shape_cast %18 : vector<1x128xf32> to vector<1x1x128xf32>
      %cst = arith.constant dense<0.000000e+00> : vector<1xf32>
      %20 = vector.multi_reduction <add>, %19, %cst [1, 2] : vector<1x1x128xf32> to vector<1xf32>
      %21 = vector.shape_cast %20 : vector<1xf32> to vector<1x1x1xf32>
      %22 = vector.extract %21[0, 0, 0] : f32 from vector<1x1x1xf32>
      %cst_10 = arith.constant 7.812500e-03 : f32
      %23 = arith.mulf %22, %cst_10 : f32
      %c0_11 = arith.constant 0 : index
      %24 = memref.load %arg2[%c0_11] : memref<1xf32, #tpu.memory_space<smem>>
      %cst_12 = arith.constant 9.900000e-01 : f32
      %25 = arith.mulf %cst_12, %24 : f32
      %cst_13 = arith.constant 0.00999999977 : f32
      %26 = arith.mulf %cst_13, %23 : f32
      %27 = arith.addf %25, %26 : f32
      %cst_14 = arith.constant 1.000000e+00 : f32
      %cst_15 = arith.constant 2.000000e+04 : f32
      %28 = arith.maximumf %cst_14, %27 : f32
      %29 = arith.minimumf %cst_15, %28 : f32
      %cst_16 = arith.constant 1.000000e+00 : f32
      %30 = arith.divf %cst_16, %29 : f32
      %cst_17 = arith.constant 5.000000e-03 : f32
      %cst_18 = arith.constant 2.500000e+02 : f32
      %31 = arith.maximumf %cst_17, %30 : f32
      %32 = arith.minimumf %cst_18, %31 : f32
      %33 = vector.broadcast %32 : f32 to vector<8x128xf32>
      %34 = arith.mulf %33, %13 : vector<8x128xf32>
      %cst_19 = arith.constant -3.40282347E+38 : f32
      %35 = vector.broadcast %cst_19 : f32 to vector<8x128xf32>
      %36 = arith.select %17, %35, %34 : vector<8x128xi1>, vector<8x128xf32>
      %c16_i32 = arith.constant 16 : i32
      %37 = vector.broadcast %c16_i32 : i32 to vector<8x128xi32>
      %38 = arith.cmpi sge, %15, %37 : vector<8x128xi32>
      %cst_20 = arith.constant -3.40282347E+38 : f32
      %39 = vector.broadcast %cst_20 : f32 to vector<8x128xf32>
      %40 = arith.select %38, %39, %36 : vector<8x128xi1>, vector<8x128xf32>
      %cst_21 = arith.constant dense<0xFF800000> : vector<8xf32>
      %41 = vector.multi_reduction <maximumf>, %40, %cst_21 [1] : vector<8x128xf32> to vector<8xf32>
      %42 = vector.shape_cast %41 : vector<8xf32> to vector<8x1xf32>
      %43 = vector.broadcast %42 : vector<8x1xf32> to vector<8x128xf32>
      %44 = arith.subf %40, %43 : vector<8x128xf32>
      %45 = math.exp %44 : vector<8x128xf32>
      %cst_22 = arith.constant 0.000000e+00 : f32
      %46 = vector.broadcast %cst_22 : f32 to vector<8x128xf32>
      %47 = arith.select %38, %46, %45 : vector<8x128xi1>, vector<8x128xf32>
      %cst_23 = arith.constant dense<0.000000e+00> : vector<8xf32>
      %48 = vector.multi_reduction <add>, %47, %cst_23 [1] : vector<8x128xf32> to vector<8xf32>
      %49 = vector.shape_cast %48 : vector<8xf32> to vector<8x1xf32>
      %cst_24 = arith.constant 1.000000e-30 : f32
      %50 = vector.broadcast %cst_24 : f32 to vector<8x1xf32>
      %51 = arith.maximumf %49, %50 : vector<8x1xf32>
      %52 = vector.broadcast %51 : vector<8x1xf32> to vector<8x128xf32>
      %53 = arith.divf %47, %52 : vector<8x128xf32>
      %cst_25 = arith.constant 1.000000e+00 : f32
      %54 = vector.broadcast %cst_25 : f32 to vector<8x128xf32>
      %55 = arith.select %17, %54, %53 : vector<8x128xi1>, vector<8x128xf32>
      %cst_26 = arith.constant 0.000000e+00 : f32
      %56 = vector.broadcast %cst_26 : f32 to vector<8x128xf32>
      %57 = arith.subf %56, %13 : vector<8x128xf32>
      %58 = arith.select %17, %13, %57 : vector<8x128xi1>, vector<8x128xf32>
      %cst_27 = arith.constant 5.000000e-01 : f32
      %59 = vector.broadcast %cst_27 : f32 to vector<8x128xf32>
      %60 = arith.subf %59, %58 : vector<8x128xf32>
      %cst_28 = arith.constant 0.000000e+00 : f32
      %61 = vector.broadcast %cst_28 : f32 to vector<8x128xf32>
      %62 = arith.maximumf %60, %61 : vector<8x128xf32>
      %cst_29 = arith.constant 5.000000e-01 : f32
      %63 = vector.broadcast %cst_29 : f32 to vector<8x128xf32>
      %64 = arith.mulf %63, %62 : vector<8x128xf32>
      %cst_30 = arith.constant 5.000000e-01 : f32
      %65 = vector.broadcast %cst_30 : f32 to vector<8x128xf32>
      %66 = arith.mulf %65, %58 : vector<8x128xf32>
      %67 = arith.subf %64, %66 : vector<8x128xf32>
      %68 = arith.mulf %67, %55 : vector<8x128xf32>
      %c0_31 = arith.constant 0 : index
      %c0_32 = arith.constant 0 : index
      %69 = vector.load %arg8[%c0_31, %c0_32] : memref<1x128xf32, #tpu.memory_space<vmem>>, vector<1x128xf32>
      %cst_33 = arith.constant dense<0.000000e+00> : vector<128xf32>
      %70 = vector.multi_reduction <add>, %68, %cst_33 [0] : vector<8x128xf32> to vector<128xf32>
      %71 = vector.shape_cast %70 : vector<128xf32> to vector<1x128xf32>
      %72 = arith.addf %69, %71 : vector<1x128xf32>
      %c0_34 = arith.constant 0 : index
      %c0_35 = arith.constant 0 : index
      %73 = vector.load %arg8[%c0_34, %c0_35] : memref<1x128xf32, #tpu.memory_space<vmem>>, vector<1x128xf32>
      tpu.vector_store %arg8[%c0_34, %c0_35], %72 {strides = array<i32>} : memref<1x128xf32, #tpu.memory_space<vmem>>, vector<1x128xf32>,
      %c0_i32_36 = arith.constant 0 : i32
      %74 = arith.cmpi eq, %arg1, %c0_i32_36 : i32
      %75 = arith.extui %74 : i1 to i32
      %c0_i32_37 = arith.constant 0 : i32
      %76 = arith.cmpi ne, %75, %c0_i32_37 : i32
      scf.if %76 {
        %c0_38 = arith.constant 0 : index
        %c0_39 = arith.constant 0 : index
        %77 = vector.load %arg8[%c0_38, %c0_39] : memref<1x128xf32, #tpu.memory_space<vmem>>, vector<1x128xf32>
        %78 = vector.shape_cast %77 : vector<1x128xf32> to vector<1x1x128xf32>
        %cst_40 = arith.constant dense<0.000000e+00> : vector<1xf32>
        %79 = vector.multi_reduction <add>, %78, %cst_40 [1, 2] : vector<1x1x128xf32> to vector<1xf32>
        %80 = vector.shape_cast %79 : vector<1xf32> to vector<1x1x1xf32>
        %81 = vector.extract %80[0, 0, 0] : f32 from vector<1x1x1xf32>
        %cst_41 = arith.constant 1.250000e-01 : f32
        %82 = arith.mulf %81, %cst_41 : f32
        %c0_42 = arith.constant 0 : index
        %c0_43 = arith.constant 0 : index
        %83 = memref.load %arg5[%c0_42, %c0_43] : memref<1x1xf32, #tpu.memory_space<smem>>
        memref.store %82, %arg5[%c0_42, %c0_43] : memref<1x1xf32, #tpu.memory_space<smem>>
        %cst_44 = arith.constant 5.000000e-03 : f32
        %cst_45 = arith.constant 1.000000e+03 : f32
        %84 = arith.maximumf %cst_44, %27 : f32
        %85 = arith.minimumf %cst_45, %84 : f32
        %c0_46 = arith.constant 0 : index
        %c0_47 = arith.constant 0 : index
        %86 = memref.load %arg6[%c0_46, %c0_47] : memref<1x1xf32, #tpu.memory_space<smem>>
        memref.store %85, %arg6[%c0_46, %c0_47] : memref<1x1xf32, #tpu.memory_space<smem>>
      } else {
      }
    } else {
    }
    return
  }
  func.func @transform_0(%arg0: i32, %arg1: i32) -> i32 {
    %c0_i32 = arith.constant 0 : i32
    %c0_i32_0 = arith.constant 0 : i32
    return %c0_i32 : i32
  }
  func.func @transform_1(%arg0: i32, %arg1: i32) -> (i32, i32) {
    %0 = arith.muli %arg1, %arg0 : i32
    %c0_i32 = arith.constant 0 : i32
    %c0_i32_0 = arith.constant 0 : i32
    return %0, %c0_i32 : i32, i32
  }
  func.func @transform_2(%arg0: i32, %arg1: i32) -> (i32, i32) {
    %c1_i32 = arith.constant 1 : i32
    %0 = arith.subi %c1_i32, %arg0 : i32
    %1 = arith.muli %arg1, %0 : i32
    %c0_i32 = arith.constant 0 : i32
    %c0_i32_0 = arith.constant 0 : i32
    return %1, %c0_i32 : i32, i32
  }
  func.func @transform_3(%arg0: i32, %arg1: i32) -> (i32, i32) {
    %c0_i32 = arith.constant 0 : i32
    %c0_i32_0 = arith.constant 0 : i32
    %c0_i32_1 = arith.constant 0 : i32
    return %c0_i32, %c0_i32_0 : i32, i32
  }
  func.func @transform_4(%arg0: i32, %arg1: i32) -> (i32, i32) {
    %c0_i32 = arith.constant 0 : i32
    %c0_i32_0 = arith.constant 0 : i32
    %c0_i32_1 = arith.constant 0 : i32
    return %c0_i32, %c0_i32_0 : i32, i32
  }
}

</mosaic_0001>

<bundles_post_ra>
// kernel: tpu_custom_call.1
= control target key start
LH: loop header
LB: loop body
LE: loop exit
PB: predicated region body
PF: predicated region fallthrough
CT: control target
= control target key end

     0   :  { %s654_s0 = inlined_call_operand.<no memory space> [shape: f32[1], index: 0, kind: input, shape index: {}]   ;;  %s655_s1 = inlined_call_operand.vmem [shape: s32[8,1], index: 1, kind: input, shape index: {}]   ;;  %s656_s2 = inlined_call_operand.vmem [shape: f32[8,128], index: 2, kind: input, shape index: {}]   ;;  %s657_s3 = inlined_call_operand.hbm [shape: f32[1,1], index: 3, kind: output, shape index: {0}]   ;;  %s658_s4 = inlined_call_operand.hbm [shape: f32[1,1], index: 4, kind: output, shape index: {1}]  }
   0x1   :  { %10 = sst [smem:[#allocation5]] %s654_s0 }
   0x2   :  { %11 = vsyncpa [#allocation7], 0 }
   0x3   :  { %12 = vsyncpa [#allocation9], 0  ;;  %s602_s17 = smov 0   ;;  %s604_s18 = smov 0  }
   0x4   :  { %s606_s19 = smov 0  }
   0x5 LB: > { %s439_s0 = sadd.s32 4294967295, %s563_s19   ;;  %s30_s20 = sadd.s32 1, %s559_s18  ;;  %s563_s19 = sphi %s606_s19, %s18_s19   ;;  %s559_s18 = sphi %s604_s18, %s660_s18   ;;  %s555_s17 = sphi %s602_s17, %s659_s17  }
   0x6   : > { %p32_p0 = scmp.ge.s32.totalorder %s30_s20, 2  ;;  %p444_p1 = scmp.ge.s32.totalorder %s563_s19, 1 }
   0x7   : > { %p190_p2 = scmp.lt.s32.totalorder %s563_s19, 3 }
   0x8   : > { %s662_s20 = smov (%p32_p0, %s30_s20), 0 }
   0x9   : > { %p191_p3 = pnand %p444_p1, %p190_p2 }
   0xa   : > { %p231_p4 = scmp.eq.s32.totalorder (!%p191_p3), %s555_s17, 0 }
   0xb   : > { %194 = sbr.rel (%p191_p3) target bundleno = 886 (0x376), region = 32 }
  0x10   : > { %236 = sbr.rel (!%p231_p4) target bundleno = 21 (0x15), region = 36  ;;  %v565_v0 = vmov (%p231_p4), 0.0  }
  0x11   : > { %237 = vst [vmem:[#allocation2] sm:$0x1] (%p231_p4), %v565_v0  ;;  %238 = vst [vmem:[#allocation3] sm:$0x1] (%p231_p4), %v565_v0 }
  0x15 PF: > { %p446_p5 = scmp.ne.s32.totalorder %s555_s17, 0 }
  0x17   : > { %241 = sbr.rel (%p446_p5) target bundleno = 46 (0x2e), region = 40 }
  0x1c   : > { %v242_v1 = vld [vmem:[%s656_s2] sm:$0xff] }
  0x1d   : > { %245 = vst [vmem:[#allocation4] sm:$0xff] %v242_v1  ;;  %v246_v2 = vand.u32 2147483647, %v242_v1  ;;  %v247_v8 = vld [vmem:[#allocation2] sm:$0x1] }
  0x1f   : > { %v248_v3 = vrot.slane %v246_v2, 4 }
  0x21   : > { %v249_v4 = vadd.f32 %v248_v3, %v246_v2 }
  0x23   : > { %v250_v5 = vrot.slane %v249_v4, 2 }
  0x25   : > { %v251_v6 = vadd.f32 %v250_v5, %v249_v4 }
  0x27   : > { %v252_v7 = vrot.slane %v251_v6, 1 }
  0x29   : > { %v253_v9 = vadd.f32 %v252_v7, %v251_v6 }
  0x2b   : > { %v254_v10 = vadd.f32 %v253_v9, %v247_v8 }
  0x2d   : > { %255 = vst [vmem:[#allocation2] sm:$0x1] %v254_v10 }
  0x2e PF: > { %p447_p6 = scmp.ne.s32.totalorder %s555_s17, 1 }
  0x2f   : > { %s283_s25 = sld [smem:[#allocation5]] (!%p447_p6)  ;;  %s567_s5 = smov (!%p447_p6), 1.0  }
  0x30   : > { %259 = sbr.rel (%p447_p6) target bundleno = 877 (0x36d), region = 44  ;;  %s568_s7 = smov (!%p447_p6), 0.005  }
  0x31   : > { %s569_s9 = smov (!%p447_p6), 20000.0   ;;  %s570_s11 = smov (!%p447_p6), 1000.0  }
  0x32   : > { %s571_s15 = smov (!%p447_p6), 250.0  }
  0x35   : > { %v270_v11 = vld [vmem:[#allocation2] sm:$0x1]  ;;  %vm271_vm0 = vcmask 1040384   ;;  %v566_v13 = vmov 0   ;;  %s284_s27 = smul.f32 0.99, %s283_s25  ;;  %v264_v24 = vlaneseq }
  0x36   : > { %v272_v12 = vsel %vm271_vm0, %v270_v11, 0.0  ;;  %506 = vset.pattern.permute.xlu0 %v566_v13  ;;  %v263_v14 = vld [vmem:[%s655_s1] sm:$0xff] }
  0x37   : > { %273 = vadd.xlane.f32.xlu0 %v272_v12  ;;  %v265_v25 = vand.u32 127, %v264_v24  ;;  %v262_v27 = vld [vmem:[#allocation4] sm:$0xff]  ;;  %v319_v55 = vld [vmem:[#allocation3] sm:$0x1] }
  0x38   : > { %v311_v37 = vsub.f32 0.0, %v262_v27 }
  0x39   : > { %vm297_vm1 = vcmp.ge.s32.totalorder %v265_v25, 16 }
  0x4d   : > { %267 = vperm.xlu0 %506, %v263_v14  }
  0xc0   : > { %v274_v15 = vpop.xlane.xlu0 %273 }
  0xc1   : > { %v275_v16 = vrot.slane %v274_v15, 4 }
  0xc3   : > { %v276_v17 = vadd.f32 %v275_v16, %v274_v15 }
  0xc5   : > { %v277_v18 = vrot.slane %v276_v17, 2 }
  0xc7   : > { %v278_v19 = vadd.f32 %v277_v18, %v276_v17 }
  0xc8   : > { %v268_v26 = vpop.permute.xlu0 %267 }
  0xc9   : > { %v279_v20 = vrot.slane %v278_v19, 1  ;;  %vm269_vm2 = vcmp.eq.s32.totalorder %v265_v25, %v268_v26 }
  0xca   : > { %v312_v40 = vsel %vm269_vm2, %v262_v27, %v311_v37 }
  0xcb   : > { %v280_v21 = vadd.f32 %v279_v20, %v278_v19  ;;  %v313_v41 = vsub.f32 0.5, %v312_v40  ;;  %v316_v44 = vmul.f32 0.5, %v312_v40 }
  0xcd   : > { %455 = vpush %v280_v21  ;;  %v314_v42 = vmax.f32 %v313_v41, 0.0 }
  0xcf   : > { %v315_v43 = vmul.f32 0.5, %v314_v42 }
  0xd1   : > { %v317_v47 = vsub.f32 %v315_v43, %v316_v44 }
  0xfe   : > { %s456_s26 = spop %455 }
  0xff   : > { %s282_s28 = smul.f32 0.0078125, %s456_s26 }
 0x101   : > { %s285_s29 = smul.f32 0.01, %s282_s28 }
 0x103   : > { %s286_s30 = sadd.f32 %s285_s29, %s284_s27 }
 0x105   : > { %s287_s6 = smax.f32 %s567_s5, %s286_s30  ;;  %s345_s8 = smax.f32 %s568_s7, %s286_s30 }
 0x106   : > { %s288_s10 = smin.f32 %s569_s9, %s287_s6  ;;  %s346_s12 = smin.f32 %s570_s11, %s345_s8 }
 0x107   : > { %v289_v22 = vstv %s288_s10  ;;  %348 = sst [smem:[#allocation8]] %s346_s12 }
 0x108   : > { %507 = vrcp.f32 %v289_v22 }
 0x115   : > { %v508_v23 = vpop.eup %507 }
 0x116   : > { %457 = vpush %v508_v23 }
 0x147   : > { %s458_s13 = spop %457 }
 0x148   : > { %s292_s14 = smax.f32 %s568_s7, %s458_s13 }
 0x149   : > { %s293_s16 = smin.f32 %s571_s15, %s292_s14 }
 0x14a   : > { %v294_v28 = vstv %s293_s16 }
 0x14b   : > { %v295_v29 = vmul.f32 %v294_v28, %v262_v27 }
 0x14d   : > { %v296_v30 = vsel %vm269_vm2, -3.4028235e+38, %v295_v29 }
 0x14e   : > { %v298_v31 = vsel %vm297_vm1, -3.4028235e+38, %v296_v30 }
 0x14f   : > { %299 = vmax.xlane.f32.xlu1 %v298_v31 }
 0x1d8   : > { %v300_v32 = vpop.xlane.xlu1 %299 }
 0x1d9   : > { %v301_v33 = vsub.f32 %v298_v31, %v300_v32 }
 0x1db   : > { %v302_v34 = vmul.f32 1.442695, %v301_v33 }
 0x1dd   : > { %509 = vpow2.f32 %v302_v34 }
 0x1ea   : > { %v510_v35 = vpop.eup %509 }
 0x1eb   : > { %v304_v36 = vsel %vm297_vm1, 0.0, %v510_v35 }
 0x1ec   : > { %305 = vadd.xlane.f32.xlu1 %v304_v36 }
 0x275   : > { %v306_v38 = vpop.xlane.xlu1 %305 }
 0x276   : > { %v307_v39 = vmax.f32 %v306_v38, 1e-30 }
 0x278   : > { %511 = vrcp.f32 %v307_v39 }
 0x285   : > { %v512_v45 = vpop.eup %511 }
 0x286   : > { %v309_v46 = vmul.f32 %v512_v45, %v304_v36 }
 0x288   : > { %v310_v48 = vsel %vm269_vm2, 1.0, %v309_v46 }
 0x289   : > { %v318_v49 = vmul.f32 %v317_v47, %v310_v48 }
 0x28b   : > { %v320_v50 = vrot.slane %v318_v49, 4 }
 0x28d   : > { %v321_v51 = vadd.f32 %v320_v50, %v318_v49 }
 0x28f   : > { %v322_v52 = vrot.slane %v321_v51, 2 }
 0x291   : > { %v323_v53 = vadd.f32 %v322_v52, %v321_v51 }
 0x293   : > { %v324_v54 = vrot.slane %v323_v53, 1 }
 0x295   : > { %v325_v56 = vadd.f32 %v324_v54, %v323_v53 }
 0x297   : > { %v326_v57 = vadd.f32 %v325_v56, %v319_v55 }
 0x299   : > { %327 = vst [vmem:[#allocation3] sm:$0x1] %v326_v57 }
 0x2a0   : > { %v331_v58 = vld [vmem:[#allocation3] sm:$0x1] }
 0x2a1   : > { %v332_v59 = vsel %vm271_vm0, %v331_v58, 0.0 }
 0x2a2   : > { %333 = vadd.xlane.f32.xlu1 %v332_v59 }
 0x32b   : > { %v334_v60 = vpop.xlane.xlu1 %333 }
 0x32c   : > { %v335_v61 = vrot.slane %v334_v60, 4 }
 0x32e   : > { %v336_v62 = vadd.f32 %v335_v61, %v334_v60 }
 0x330   : > { %v337_v63 = vrot.slane %v336_v62, 2 }
 0x332   : > { %v338_v0 = vadd.f32 %v337_v63, %v336_v62 }
 0x334   : > { %v339_v1 = vrot.slane %v338_v0, 1 }
 0x336   : > { %v340_v2 = vadd.f32 %v339_v1, %v338_v0 }
 0x338   : > { %459 = vpush %v340_v2 }
 0x369   : > { %s460_s17 = spop %459 }
 0x36a   : > { %s342_s21 = smul.f32 0.125, %s460_s17 }
 0x36c   : > { %344 = sst [smem:[#allocation6]] %s342_s21 }
 0x36d PF: > { %p469_p7 = scmp.eq.s32.totalorder %s439_s0, 1  ;;  %s572_s22 = smov [#allocation6]  }
 0x36e   : > { %s573_s25 = smov [#allocation8]  }
 0x36f   : > { %462 = dma.smem_to_hbm (%p469_p7), %s572_s22, 16, %s657_s3, [#allocation7]  }
 0x370   : > { %464 = dma.smem_to_hbm (%p469_p7), %s573_s25, 16, %s658_s4, [#allocation9]  }
 0x371   : > { %546 = dma.done.wait (%p469_p7), [#allocation7], 16  }
 0x372   : > { %548 = vsyncadd (%p469_p7), [#allocation7], 4294967280 }
 0x373   : > { %550 = dma.done.wait (%p469_p7), [#allocation9], 16  }
 0x374   : > { %552 = vsyncadd (%p469_p7), [#allocation9], 4294967280 }
 0x375   : > { %375 = sfence }
 0x376 PF: > { %s18_s19 = sadd.s32 1, %s563_s19   ;;  %s659_s17 = smov %s559_s18 }
 0x377   : > { %p15_p8 = scmp.ge.s32.totalorder %s18_s19, 4   ;;  %s660_s18 = smov %s662_s20 }
 0x379   :  { %17 = sbr.rel (!%p15_p8) target bundleno = 5 (0x5), region = 90 }
 0x37e   :  { %381 = vsyncpa [#allocation7], 1 }
 0x37f   :  { %383 = vsyncpa [#allocation7 + $0x1], 1 }
 0x380   :  { %384 = vsyncpa [#allocation9], 1 }

</bundles_post_ra>
